<compile_context>
chip_gen: v6e
topology: v6e:2x2x1
jax: 0.10.0
libtpu: 0.0.40
codegen_flags: <defaults>
</compile_context>

<pallas_src>
import math

import jax
import jax.numpy as jnp
from jax.experimental import pallas as pl
from jax.experimental.pallas import tpu as pltpu

LANE = 128


def _round_up(n, m):
    return ((n + m - 1) // m) * m


def _num_tensorcores():
    """Best-effort chip probe: v7x has 2 TensorCores/chip, v5e/v6e have 1."""
    try:
        kind = jax.devices()[0].device_kind.lower()
    except Exception:
        return 1
    return 2 if ("v7" in kind or "7x" in kind) else 1


def _pick_tm(B, compute_dtype):
    """Batch-tile heuristic. Returns a legal block row count (multiple of the
    row granularity, or the full batch)."""
    # bf16 packs two rows per sublane -> 16-row granular tiles; f32 -> 8.
    row = 16 if jnp.dtype(compute_dtype).itemsize < 4 else 8
    if _num_tensorcores() >= 2:
        # v7x: even number of grid steps so both TensorCores get equal work.
        if B <= row:
            return B
        steps = max(2, pl.cdiv(B, 2048))
        steps += steps % 2
    else:
        # v5e / v6e: one TensorCore -- extra grid steps only add ~0.35us each.
        if B <= 2048:
            return B
        steps = pl.cdiv(B, 2048)
    tm = _round_up(pl.cdiv(B, steps), row)
    return tm if tm < B else B


# ----------------------------- Pallas kernel ---------------------------------
def _mlp_kernel(x_ref,
                w1_ref, b1_ref, w2_ref, b2_ref,
                w3_ref, b3_ref, w4_ref, b4_ref,
                o_ref, xpad_ref):
    """Fused 4x (matmul + bias + ReLU) on one batch tile; everything in VMEM.

    x_ref is the *unpadded* (tm, in_dim) f32 tile. It is zero-padded to the
    MXU-aligned width K1 = w1_ref.shape[0] inside the VMEM scratch xpad_ref, so
    no padded copy of x ever touches HBM and every matmul contraction dim is
    exactly zero-padded (no reliance on implicit-padding masking).
    """
    cdt = w1_ref.dtype                      # MXU feed dtype (bf16 or f32)
    tm, d_in = x_ref.shape
    k1 = w1_ref.shape[0]

    if k1 > d_in:                           # zero the (few) pad lanes
        xpad_ref[:, d_in:k1] = jnp.zeros((tm, k1 - d_in), xpad_ref.dtype)
    xpad_ref[:, 0:d_in] = x_ref[...]

    h = xpad_ref[...].astype(cdt)

    h = jnp.maximum(
        jnp.dot(h, w1_ref[...], preferred_element_type=jnp.float32)
        + b1_ref[...], 0.0).astype(cdt)
    h = jnp.maximum(
        jnp.dot(h, w2_ref[...], preferred_element_type=jnp.float32)
        + b2_ref[...], 0.0).astype(cdt)
    h = jnp.maximum(
        jnp.dot(h, w3_ref[...], preferred_element_type=jnp.float32)
        + b3_ref[...], 0.0).astype(cdt)
    h = jnp.maximum(
        jnp.dot(h, w4_ref[...], preferred_element_type=jnp.float32)
        + b4_ref[...], 0.0)

    o_ref[...] = h.astype(o_ref.dtype)


# ----------------------- One-time parameter preparation -----------------------
def prepare_params(params, compute_dtype=jnp.bfloat16):
    """Pad/cast parameters ONCE (load time, not per forward call).

    K dims are zero-padded to 128-multiples, hidden N dims are zero-padded to
    128 (lane-dense MXU feeds); the last layer's N stays at its true width so
    the kernel writes an unpadded (B, out_dim) result. Zero padding is exact:
    zero rows/cols contribute 0 to the dots, pad bias = 0, ReLU(0) = 0.
    """
    prepared = []
    n_layers = len(params)
    k_pad = _round_up(params[0][0].shape[0], LANE)
    for li, (w, b) in enumerate(params):
        k, n = w.shape
        last = (li == n_layers - 1)
        n_pad = n if last else _round_up(n, LANE)
        w_p = jnp.pad(w, ((0, k_pad - k), (0, n_pad - n))).astype(compute_dtype)
        b_p = jnp.pad(b.reshape(1, -1), ((0, 0), (0, n_pad - n))).astype(jnp.float32)
        prepared.extend([w_p, b_p])
        k_pad = n_pad
    return tuple(prepared)


# ------------------------------ Host wrapper ----------------------------------
def local_model_forward(x, prepared, *, tm=None):
    """x: (B, in_dim) float32 (unpadded); prepared: output of prepare_params."""
    B, in_dim = x.shape
    weights = prepared[0::2]
    compute_dtype = weights[0].dtype
    k1 = weights[0].shape[0]
    out_dim = weights[-1].shape[1]

    if tm is None:
        tm = _pick_tm(B, compute_dtype)
    grid = (pl.cdiv(B, tm),)

    # Full-array resident VMEM blocks for the (tiny, <0.3 MiB) parameters.
    param_specs = [pl.BlockSpec(p.shape, lambda i: (0, 0)) for p in prepared]

    flops = 2 * B * sum(int(w.shape[0]) * int(w.shape[1]) for w in weights)
    bytes_accessed = int(x.size) * x.dtype.itemsize \
        + sum(int(p.size) * p.dtype.itemsize for p in prepared) \
        + B * out_dim * 4
    cost = pl.CostEstimate(flops=flops, transcendentals=0,
                           bytes_accessed=int(bytes_accessed))

    return pl.pallas_call(
        _mlp_kernel,
        out_shape=jax.ShapeDtypeStruct((B, out_dim), jnp.float32),
        grid=grid,
        in_specs=[pl.BlockSpec((tm, in_dim), lambda i: (i, 0))] + param_specs,
        out_specs=pl.BlockSpec((tm, out_dim), lambda i: (i, 0)),
        scratch_shapes=[pltpu.VMEM((tm, k1), jnp.float32)],
        compiler_params=pltpu.CompilerParams(
            dimension_semantics=("parallel",),
            vmem_limit_bytes=32 * 1024 * 1024),
        cost_estimate=cost,
    )(x, *prepared)


# ------------------------------ Param init / reference -------------------------
def init_params(key, dims):
    """Mimics nn.Linear's default init: U(-1/sqrt(fan_in), +1/sqrt(fan_in))."""
    params = []
    for d_in, d_out in zip(dims[:-1], dims[1:]):
        key, kw, kb = jax.random.split(key, 3)
        bound = 1.0 / math.sqrt(d_in)
        w = jax.random.uniform(kw, (d_in, d_out), jnp.float32, -bound, bound)
        b = jax.random.uniform(kb, (1, d_out), jnp.float32, -bound, bound)
        params.append((w, b))
    return params


def reference_forward(x, params):
    h = x
    for w, b in params:
        h = jnp.maximum(
            jnp.dot(h, w, precision=jax.lax.Precision.HIGHEST) + b, 0.0)
    return h


# --------------------------------- Main ---------------------------------------
if __name__ == "__main__":
    # client_number == 0, args.client_num = 5  ->  in_dim = ceil(561 / 5) = 113
    client_num = 5
    in_dim = math.ceil(561 / client_num)
    dims = (in_dim, 140, 70, 35, 16)

    batch = 32
    key = jax.random.PRNGKey(0)
    key, kx = jax.random.split(key)
    x = jax.random.normal(kx, (batch, in_dim), jnp.float32)
    params = init_params(key, dims)

    ref = reference_forward(x, params)
    fwd = jax.jit(local_model_forward)

    # f32 MXU feed: tracks the f32 reference tightly.
    prep_f32 = prepare_params(params, compute_dtype=jnp.float32)
    out_f32 = jax.block_until_ready(fwd(x, prep_f32))
    assert out_f32.shape == (batch, 16)
    assert jnp.allclose(out_f32, ref, atol=1e-2, rtol=1e-2), "f32 path mismatch"

    # Ragged-batch path: force a partial final tile (B=32, tm=24 -> grid of 2,
    # last tile half out-of-bounds). Valid rows must still be correct.
    out_ragged = jax.block_until_ready(local_model_forward(x, prep_f32, tm=24))
    assert jnp.allclose(out_ragged, ref, atol=1e-2, rtol=1e-2), "ragged-tile mismatch"

    # Default bf16 MXU feed (recommended on v5e/v6e/v7x); f32 accumulation,
    # bias + ReLU in f32. Expected error after 4 bf16-fed layers: few 1e-3.
    prep_bf16 = prepare_params(params)
    out_bf16 = jax.block_until_ready(fwd(x, prep_bf16))
    assert out_bf16.shape == (batch, 16)
    assert jnp.allclose(out_bf16, ref, atol=5e-2, rtol=5e-2), "bf16 path out of tolerance"
    assert bool(jnp.all(jnp.isfinite(out_bf16)))

    print("KERNEL_OK")
</pallas_src>

<mosaic_0001>
module attributes {stable_mosaic.version = 11 : i64} {
  func.func @_mlp_kernel(%arg0: i32, %arg1: memref<32x113xf32, #tpu.memory_space<vmem>>, %arg2: memref<128x256xf32, #tpu.memory_space<vmem>>, %arg3: memref<1x256xf32, #tpu.memory_space<vmem>>, %arg4: memref<256x128xf32, #tpu.memory_space<vmem>>, %arg5: memref<1x128xf32, #tpu.memory_space<vmem>>, %arg6: memref<128x128xf32, #tpu.memory_space<vmem>>, %arg7: memref<1x128xf32, #tpu.memory_space<vmem>>, %arg8: memref<128x16xf32, #tpu.memory_space<vmem>>, %arg9: memref<1x16xf32, #tpu.memory_space<vmem>>, %arg10: memref<32x16xf32, #tpu.memory_space<vmem>>, %arg11: memref<32x128xf32, #tpu.memory_space<vmem>>) attributes {dimension_semantics = [#tpu.dimension_semantics<parallel>], iteration_bounds = array<i64: 1>, scalar_prefetch = 0 : i64, scratch_operands = 1 : i64, tpu.core_type = #tpu.core_type<tc>, window_params = [{transform_indices = @transform_0, window_bounds = array<i64: 32, 113>}, {pipeline_mode = #tpu.pipeline_mode<synchronous>, transform_indices = @transform_1, window_bounds = array<i64: 128, 256>}, {pipeline_mode = #tpu.pipeline_mode<synchronous>, transform_indices = @transform_2, window_bounds = array<i64: 1, 256>}, {pipeline_mode = #tpu.pipeline_mode<synchronous>, transform_indices = @transform_3, window_bounds = array<i64: 256, 128>}, {pipeline_mode = #tpu.pipeline_mode<synchronous>, transform_indices = @transform_4, window_bounds = array<i64: 1, 128>}, {pipeline_mode = #tpu.pipeline_mode<synchronous>, transform_indices = @transform_5, window_bounds = array<i64: 128, 128>}, {pipeline_mode = #tpu.pipeline_mode<synchronous>, transform_indices = @transform_6, window_bounds = array<i64: 1, 128>}, {pipeline_mode = #tpu.pipeline_mode<synchronous>, transform_indices = @transform_7, window_bounds = array<i64: 128, 16>}, {pipeline_mode = #tpu.pipeline_mode<synchronous>, transform_indices = @transform_8, window_bounds = array<i64: 1, 16>}, {transform_indices = @transform_9, window_bounds = array<i64: 32, 16>}]} {
    %cst = arith.constant 0.000000e+00 : f32
    %0 = vector.broadcast %cst : f32 to vector<32x15xf32>
    %c0 = arith.constant 0 : index
    %c113 = arith.constant 113 : index
    %1 = vector.load %arg11[%c0, %c113] : memref<32x128xf32, #tpu.memory_space<vmem>>, vector<32x15xf32>
    tpu.vector_store %arg11[%c0, %c113], %0 {strides = array<i32>} : memref<32x128xf32, #tpu.memory_space<vmem>>, vector<32x15xf32>,
    %c0_0 = arith.constant 0 : index
    %c0_1 = arith.constant 0 : index
    %2 = vector.load %arg1[%c0_0, %c0_1] : memref<32x113xf32, #tpu.memory_space<vmem>>, vector<32x113xf32>
    %c0_2 = arith.constant 0 : index
    %c0_3 = arith.constant 0 : index
    %3 = vector.load %arg11[%c0_2, %c0_3] : memref<32x128xf32, #tpu.memory_space<vmem>>, vector<32x113xf32>
    tpu.vector_store %arg11[%c0_2, %c0_3], %2 {strides = array<i32>} : memref<32x128xf32, #tpu.memory_space<vmem>>, vector<32x113xf32>,
    %c0_4 = arith.constant 0 : index
    %c0_5 = arith.constant 0 : index
    %4 = vector.load %arg11[%c0_4, %c0_5] : memref<32x128xf32, #tpu.memory_space<vmem>>, vector<32x128xf32>
    %c0_6 = arith.constant 0 : index
    %c0_7 = arith.constant 0 : index
    %5 = vector.load %arg2[%c0_6, %c0_7] : memref<128x256xf32, #tpu.memory_space<vmem>>, vector<128x256xf32>
    %cst_8 = arith.constant dense<0.000000e+00> : vector<32x256xf32>
    %6 = tpu.matmul %4, %5, %cst_8 {dimension_numbers = #tpu.dot_dimension_numbers<[1], [0], [0], [1], [0, 0, 1, 1], [], []>} : vector<32x128xf32>, vector<128x256xf32>, vector<32x256xf32> -> vector<32x256xf32>
    %c0_9 = arith.constant 0 : index
    %c0_10 = arith.constant 0 : index
    %7 = vector.load %arg3[%c0_9, %c0_10] : memref<1x256xf32, #tpu.memory_space<vmem>>, vector<1x256xf32>
    %8 = vector.broadcast %7 : vector<1x256xf32> to vector<32x256xf32>
    %9 = arith.addf %6, %8 : vector<32x256xf32>
    %cst_11 = arith.constant 0.000000e+00 : f32
    %10 = vector.broadcast %cst_11 : f32 to vector<32x256xf32>
    %11 = arith.maximumf %9, %10 : vector<32x256xf32>
    %c0_12 = arith.constant 0 : index
    %c0_13 = arith.constant 0 : index
    %12 = vector.load %arg4[%c0_12, %c0_13] : memref<256x128xf32, #tpu.memory_space<vmem>>, vector<256x128xf32>
    %cst_14 = arith.constant dense<0.000000e+00> : vector<32x128xf32>
    %13 = tpu.matmul %11, %12, %cst_14 {dimension_numbers = #tpu.dot_dimension_numbers<[1], [0], [0], [1], [0, 0, 1, 1], [], []>} : vector<32x256xf32>, vector<256x128xf32>, vector<32x128xf32> -> vector<32x128xf32>
    %c0_15 = arith.constant 0 : index
    %c0_16 = arith.constant 0 : index
    %14 = vector.load %arg5[%c0_15, %c0_16] : memref<1x128xf32, #tpu.memory_space<vmem>>, vector<1x128xf32>
    %15 = vector.broadcast %14 : vector<1x128xf32> to vector<32x128xf32>
    %16 = arith.addf %13, %15 : vector<32x128xf32>
    %cst_17 = arith.constant 0.000000e+00 : f32
    %17 = vector.broadcast %cst_17 : f32 to vector<32x128xf32>
    %18 = arith.maximumf %16, %17 : vector<32x128xf32>
    %c0_18 = arith.constant 0 : index
    %c0_19 = arith.constant 0 : index
    %19 = vector.load %arg6[%c0_18, %c0_19] : memref<128x128xf32, #tpu.memory_space<vmem>>, vector<128x128xf32>
    %cst_20 = arith.constant dense<0.000000e+00> : vector<32x128xf32>
    %20 = tpu.matmul %18, %19, %cst_20 {dimension_numbers = #tpu.dot_dimension_numbers<[1], [0], [0], [1], [0, 0, 1, 1], [], []>} : vector<32x128xf32>, vector<128x128xf32>, vector<32x128xf32> -> vector<32x128xf32>
    %c0_21 = arith.constant 0 : index
    %c0_22 = arith.constant 0 : index
    %21 = vector.load %arg7[%c0_21, %c0_22] : memref<1x128xf32, #tpu.memory_space<vmem>>, vector<1x128xf32>
    %22 = vector.broadcast %21 : vector<1x128xf32> to vector<32x128xf32>
    %23 = arith.addf %20, %22 : vector<32x128xf32>
    %cst_23 = arith.constant 0.000000e+00 : f32
    %24 = vector.broadcast %cst_23 : f32 to vector<32x128xf32>
    %25 = arith.maximumf %23, %24 : vector<32x128xf32>
    %c0_24 = arith.constant 0 : index
    %c0_25 = arith.constant 0 : index
    %26 = vector.load %arg8[%c0_24, %c0_25] : memref<128x16xf32, #tpu.memory_space<vmem>>, vector<128x16xf32>
    %cst_26 = arith.constant dense<0.000000e+00> : vector<32x16xf32>
    %27 = tpu.matmul %25, %26, %cst_26 {dimension_numbers = #tpu.dot_dimension_numbers<[1], [0], [0], [1], [0, 0, 1, 1], [], []>} : vector<32x128xf32>, vector<128x16xf32>, vector<32x16xf32> -> vector<32x16xf32>
    %c0_27 = arith.constant 0 : index
    %c0_28 = arith.constant 0 : index
    %28 = vector.load %arg9[%c0_27, %c0_28] : memref<1x16xf32, #tpu.memory_space<vmem>>, vector<1x16xf32>
    %29 = vector.broadcast %28 : vector<1x16xf32> to vector<32x16xf32>
    %30 = arith.addf %27, %29 : vector<32x16xf32>
    %cst_29 = arith.constant 0.000000e+00 : f32
    %31 = vector.broadcast %cst_29 : f32 to vector<32x16xf32>
    %32 = arith.maximumf %30, %31 : vector<32x16xf32>
    %c0_30 = arith.constant 0 : index
    %c0_31 = arith.constant 0 : index
    %33 = vector.load %arg10[%c0_30, %c0_31] : memref<32x16xf32, #tpu.memory_space<vmem>>, vector<32x16xf32>
    tpu.vector_store %arg10[%c0_30, %c0_31], %32 {strides = array<i32>} : memref<32x16xf32, #tpu.memory_space<vmem>>, vector<32x16xf32>,
    return
  }
  func.func @transform_0(%arg0: i32) -> (i32, i32) {
    %c0_i32 = arith.constant 0 : i32
    %c0_i32_0 = arith.constant 0 : i32
    return %arg0, %c0_i32 : i32, i32
  }
  func.func @transform_1(%arg0: i32) -> (i32, i32) {
    %c0_i32 = arith.constant 0 : i32
    %c0_i32_0 = arith.constant 0 : i32
    %c0_i32_1 = arith.constant 0 : i32
    return %c0_i32, %c0_i32_0 : i32, i32
  }
  func.func @transform_2(%arg0: i32) -> (i32, i32) {
    %c0_i32 = arith.constant 0 : i32
    %c0_i32_0 = arith.constant 0 : i32
    %c0_i32_1 = arith.constant 0 : i32
    return %c0_i32, %c0_i32_0 : i32, i32
  }
  func.func @transform_3(%arg0: i32) -> (i32, i32) {
    %c0_i32 = arith.constant 0 : i32
    %c0_i32_0 = arith.constant 0 : i32
    %c0_i32_1 = arith.constant 0 : i32
    return %c0_i32, %c0_i32_0 : i32, i32
  }
  func.func @transform_4(%arg0: i32) -> (i32, i32) {
    %c0_i32 = arith.constant 0 : i32
    %c0_i32_0 = arith.constant 0 : i32
    %c0_i32_1 = arith.constant 0 : i32
    return %c0_i32, %c0_i32_0 : i32, i32
  }
  func.func @transform_5(%arg0: i32) -> (i32, i32) {
    %c0_i32 = arith.constant 0 : i32
    %c0_i32_0 = arith.constant 0 : i32
    %c0_i32_1 = arith.constant 0 : i32
    return %c0_i32, %c0_i32_0 : i32, i32
  }
  func.func @transform_6(%arg0: i32) -> (i32, i32) {
    %c0_i32 = arith.constant 0 : i32
    %c0_i32_0 = arith.constant 0 : i32
    %c0_i32_1 = arith.constant 0 : i32
    return %c0_i32, %c0_i32_0 : i32, i32
  }
  func.func @transform_7(%arg0: i32) -> (i32, i32) {
    %c0_i32 = arith.constant 0 : i32
    %c0_i32_0 = arith.constant 0 : i32
    %c0_i32_1 = arith.constant 0 : i32
    return %c0_i32, %c0_i32_0 : i32, i32
  }
  func.func @transform_8(%arg0: i32) -> (i32, i32) {
    %c0_i32 = arith.constant 0 : i32
    %c0_i32_0 = arith.constant 0 : i32
    %c0_i32_1 = arith.constant 0 : i32
    return %c0_i32, %c0_i32_0 : i32, i32
  }
  func.func @transform_9(%arg0: i32) -> (i32, i32) {
    %c0_i32 = arith.constant 0 : i32
    %c0_i32_0 = arith.constant 0 : i32
    return %arg0, %c0_i32 : i32, i32
  }
}

</mosaic_0001>

<bundles_post_ra>
// kernel: local_model_forward.1
= control target key start
LH: loop header
LB: loop body
LE: loop exit
PB: predicated region body
PF: predicated region fallthrough
CT: control target
= control target key end

     0   :  { %14 = vsyncpa [#allocation4], 0  ;;  %s1029_s0 = inlined_call_operand.hbm [shape: f32[32,113], index: 0, kind: input, shape index: {}]   ;;  %s1030_s1 = inlined_call_operand.hbm [shape: f32[128,256], index: 1, kind: input, shape index: {}]   ;;  %s1031_s2 = inlined_call_operand.vmem [shape: f32[1,256], index: 2, kind: input, shape index: {}]   ;;  %s1032_s3 = inlined_call_operand.hbm [shape: f32[256,128], index: 3, kind: input, shape index: {}]   ;;  %s1033_s4 = inlined_call_operand.vmem [shape: f32[1,128], index: 4, kind: input, shape index: {}]   ;;  %s1034_s5 = inlined_call_operand.vmem [shape: f32[128,128], index: 5, kind: input, shape index: {}]   ;;  %s1035_s6 = inlined_call_operand.vmem [shape: f32[1,128], index: 6, kind: input, shape index: {}]   ;;  %s1036_s7 = inlined_call_operand.vmem [shape: f32[128,16], index: 7, kind: input, shape index: {}]   ;;  %s1037_s8 = inlined_call_operand.vmem [shape: f32[1,16], index: 8, kind: input, shape index: {}]   ;;  %s1038_s9 = inlined_call_operand.vmem [shape: f32[32,16], index: 9, kind: output, shape index: {}]  }
   0x1   :  { %15 = vsyncpa [#allocation6], 0  ;;  %s830_s30 = smov [#allocation5]  }
   0x2   :  { %s33_s10 = sshll.u32 %s830_s30, 4  ;;  %s34_s10 = int_to_ptr.vmem [resolvable:$true] %s33_s10 }
   0x3   :  { %s774_s11 = scalar_lea.vmem %s34_s10, 4096  ;;  %p779_p1 = scmp.lt.s32.totalorder %s34_s10, %s34_s10 }
   0x4   :  { %p775_p0 = scmp.ne.s32.totalorder %s34_s10, %s774_s11  ;;  %p780_p2 = scmp.lt.s32.totalorder %s774_s11, %s774_s11 }
   0x6   :  { %p781_p3 = por %p780_p2, %p779_p1 }
   0x8   :  { %p782_p4 = pnand %p781_p3, %p775_p0 }
   0xa   :  { %785 = shalt.err (!%p782_p4)
}
   0xb   :  { %s831_s12 = smov 256   ;;  %s832_s13 = smov 16  }
   0xc   :  { %39 = dma.hbm_to_vmem [thread:$0]  %s1030_s1, 4096, %s34_s10, [#allocation6], %s831_s12, %s831_s12, %s832_s13  }
   0xd   :  { %s833_s16 = smov [#allocation3]  }
   0xe   :  { %s21_s17 = sshll.u32 %s833_s16, 4  ;;  %s22_s17 = int_to_ptr.vmem [resolvable:$true] %s21_s17 }
   0xf   :  { %s794_s18 = scalar_lea.vmem %s22_s17, 512  ;;  %p799_p6 = scmp.lt.s32.totalorder %s22_s17, %s22_s17 }
  0x10   :  { %p795_p5 = scmp.ne.s32.totalorder %s22_s17, %s794_s18  ;;  %p800_p7 = scmp.lt.s32.totalorder %s794_s18, %s794_s18 }
  0x12   :  { %p801_p8 = por %p800_p7, %p799_p6 }
  0x14   :  { %p802_p9 = pnand %p801_p8, %p795_p5 }
  0x16   :  { %805 = shalt.err (!%p802_p9)
}
  0x17   :  { %s834_s19 = smov 128   ;;  %s835_s20 = smov 8  }
  0x18   :  { %27 = dma.hbm_to_vmem [thread:$0]  %s1029_s0, 512, %s22_s17, [#allocation4], %s834_s19, %s834_s19, %s835_s20  }
  0x19   :  { %s836_s23 = smov [#allocation7]  }
  0x1a   :  { %s47_s24 = sshll.u32 %s836_s23, 4  ;;  %s48_s24 = int_to_ptr.vmem [resolvable:$true] %s47_s24 }
  0x1b   :  { %s814_s1 = scalar_lea.vmem %s48_s24, 4096  ;;  %p819_p11 = scmp.lt.s32.totalorder %s48_s24, %s48_s24 }
  0x1c   :  { %p815_p10 = scmp.ne.s32.totalorder %s48_s24, %s814_s1  ;;  %p820_p12 = scmp.lt.s32.totalorder %s814_s1, %s814_s1 }
  0x1e   :  { %p821_p13 = por %p820_p12, %p819_p11 }
  0x20   :  { %p822_p0 = pnand %p821_p13, %p815_p10 }
  0x22   :  { %825 = shalt.err (!%p822_p0)
}
  0x23   :  { %53 = dma.hbm_to_vmem [thread:$0]  %s1032_s3, 4096, %s48_s24, [#allocation6], %s834_s19, %s834_s19, %s835_s20  }
  0x24   :  { %826 = dma.done.wait [#allocation4], 512  }
  0x25   :  { %827 = vsyncadd [#allocation4], 4294966784 }
  0x26   :  { %828 = dma.done.wait [#allocation6], 8192  }
  0x27   :  { %829 = vsyncadd [#allocation6], 4294959104  ;;  %vm73_vm0 = vcmask 1048456   ;;  %v837_v0 = vmov 0.0   ;;  %v122_v1 = vld [vmem:[#allocation5 + $0xf8] sm:$0xff]  ;;  %v121_v2 = vld [vmem:[#allocation5 + $0xf0] sm:$0xff] }
  0x28   :  { %74 = vst.msk [vmem:[#allocation2] sm:$0xff] %vm73_vm0, %v837_v0  ;;  %75 = vst.msk [vmem:[#allocation2 + $0x8] sm:$0xff] %vm73_vm0, %v837_v0  ;;  %199 = vmatprep.mubr.f32.mxu0 %v837_v0  ;;  %v120_v3 = vld [vmem:[#allocation5 + $0xe8] sm:$0xff]  ;;  %135 = vmatprep.subr.mxu0 %v122_v1  ;;  %v119_v4 = vld [vmem:[#allocation5 + $0xe0] sm:$0xff]  ;;  %vm82_vm1 = vcmask 924672   ;;  %vm584_vm2 = vcmask 130048  }
  0x29   :  { %76 = vst.msk [vmem:[#allocation2 + $0x10] sm:$0xff] %vm73_vm0, %v837_v0  ;;  %77 = vst.msk [vmem:[#allocation2 + $0x18] sm:$0xff] %vm73_vm0, %v837_v0  ;;  %136 = vmatpush1.msra.mxu0 %v121_v2  ;;  %v118_v5 = vld [vmem:[#allocation5 + $0xd8] sm:$0xff]  ;;  %v117_v6 = vld [vmem:[#allocation5 + $0xd0] sm:$0xff] }
  0x2a   :  { %137 = vmatprep.subr.mxu0 %v120_v3  ;;  %v116_v7 = vld [vmem:[#allocation5 + $0xc8] sm:$0xff]  ;;  %v115_v8 = vld [vmem:[#allocation5 + $0xc0] sm:$0xff]  ;;  %v114_v9 = vld [vmem:[#allocation5 + $0xb8] sm:$0xff] }
  0x2b   :  { %138 = vmatpush1.msra.mxu0 %v119_v4  ;;  %v113_v10 = vld [vmem:[#allocation5 + $0xb0] sm:$0xff]  ;;  %v112_v11 = vld [vmem:[#allocation5 + $0xa8] sm:$0xff]  ;;  %v111_v12 = vld [vmem:[#allocation5 + $0xa0] sm:$0xff] }
  0x2c   :  { %139 = vmatprep.subr.mxu0 %v118_v5  ;;  %v110_v13 = vld [vmem:[#allocation5 + $0x98] sm:$0xff]  ;;  %v109_v14 = vld [vmem:[#allocation5 + $0x90] sm:$0xff]  ;;  %v108_v15 = vld [vmem:[#allocation5 + $0x88] sm:$0xff] }
  0x2d   :  { %140 = vmatpush1.msra.mxu0 %v117_v6  ;;  %v78_v16 = vld [vmem:[#allocation3] sm:$0xff]  ;;  %v79_v17 = vld [vmem:[#allocation3 + $0x8] sm:$0xff]  ;;  %v80_v18 = vld [vmem:[#allocation3 + $0x10] sm:$0xff] }
  0x2e   :  { %141 = vmatprep.subr.mxu0 %v116_v7  ;;  %83 = vst.msk [vmem:[#allocation2] sm:$0xff] %vm82_vm1, %v78_v16  ;;  %v81_v19 = vld [vmem:[#allocation3 + $0x18] sm:$0xff]  ;;  %84 = vst.msk [vmem:[#allocation2 + $0x8] sm:$0xff] %vm82_vm1, %v79_v17  ;;  %v262_v22 = vld [vmem:[#allocation7 + $0xf0] sm:$0xff] }
  0x2f   :  { %142 = vmatpush1.msra.mxu0 %v115_v8  ;;  %85 = vst.msk [vmem:[#allocation2 + $0x10] sm:$0xff] %vm82_vm1, %v80_v18  ;;  %86 = vst.msk [vmem:[#allocation2 + $0x18] sm:$0xff] %vm82_vm1, %v81_v19  ;;  %v263_v20 = vld [vmem:[#allocation7 + $0xf8] sm:$0xff]  ;;  %v107_v23 = vld [vmem:[#allocation5 + $0x80] sm:$0xff]  ;;  %v125_v19 = vlaneseq }
  0x30   :  { %143 = vmatprep.subr.mxu0 %v114_v9  ;;  %v247_v21 = vld [vmem:[#allocation7 + $0x78] sm:$0xff]  ;;  %598 = vmatprep.subr.mxu1 %v263_v20  ;;  %v246_v24 = vld [vmem:[#allocation7 + $0x70] sm:$0xff]  ;;  %v261_v26 = vld [vmem:[#allocation7 + $0xe8] sm:$0xff] }
  0x31   :  { %144 = vmatpush1.msra.mxu0 %v113_v10  ;;  %v106_v25 = vld [vmem:[#allocation5 + $0x78] sm:$0xff]  ;;  %599 = vmatpush3.msra.mxu1 %v247_v21  ;;  %v105_v27 = vld [vmem:[#allocation5 + $0x70] sm:$0xff]  ;;  %v245_v28 = vld [vmem:[#allocation7 + $0x68] sm:$0xff]  ;;  %v126_v20 = vshrl.u32 %v125_v19, 7 }
  0x32   :  { %145 = vmatprep.subr.mxu0 %v112_v11  ;;  %600 = vmatprep.subr.mxu1 %v262_v22  ;;  %v104_v29 = vld [vmem:[#allocation5 + $0x68] sm:$0xff]  ;;  %v260_v30 = vld [vmem:[#allocation7 + $0xe0] sm:$0xff]  ;;  %v102_v33 = vld [vmem:[#allocation5 + $0x58] sm:$0xff] }
  0x33   :  { %146 = vmatpush1.msra.mxu0 %v111_v12  ;;  %601 = vmatpush3.msra.mxu1 %v246_v24  ;;  %v103_v31 = vld [vmem:[#allocation5 + $0x60] sm:$0xff]  ;;  %v259_v34 = vld [vmem:[#allocation7 + $0xd8] sm:$0xff]  ;;  %v101_v35 = vld [vmem:[#allocation5 + $0x50] sm:$0xff]  ;;  %v127_v21 = vsub.s32 0, %v126_v20 }
  0x34   :  { %147 = vmatprep.subr.mxu0 %v110_v13  ;;  %602 = vmatprep.subr.mxu1 %v261_v26  ;;  %v244_v32 = vld [vmem:[#allocation7 + $0x60] sm:$0xff]  ;;  %v243_v36 = vld [vmem:[#allocation7 + $0x58] sm:$0xff]  ;;  %v100_v37 = vld [vmem:[#allocation5 + $0x48] sm:$0xff] }
  0x35   :  { %148 = vmatpush1.msra.mxu0 %v109_v14  ;;  %603 = vmatpush3.msra.mxu1 %v245_v28  ;;  %v258_v38 = vld [vmem:[#allocation7 + $0xd0] sm:$0xff]  ;;  %v99_v39 = vld [vmem:[#allocation5 + $0x40] sm:$0xff]  ;;  %v98_v41 = vld [vmem:[#allocation5 + $0x38] sm:$0xff] }
  0x36   :  { %149 = vmatprep.subr.mxu0 %v108_v15  ;;  %604 = vmatprep.subr.mxu1 %v260_v30  ;;  %v242_v40 = vld [vmem:[#allocation7 + $0x50] sm:$0xff]  ;;  %v257_v42 = vld [vmem:[#allocation7 + $0xc8] sm:$0xff]  ;;  %v256_v46 = vld [vmem:[#allocation7 + $0xc0] sm:$0xff] }
  0x37   :  { %150 = vmatpush1.msra.mxu0 %v107_v23  ;;  %605 = vmatpush3.msra.mxu1 %v244_v32  ;;  %v97_v43 = vld [vmem:[#allocation5 + $0x30] sm:$0xff]  ;;  %v241_v44 = vld [vmem:[#allocation7 + $0x48] sm:$0xff]  ;;  %v95_v47 = vld [vmem:[#allocation5 + $0x20] sm:$0xff]  ;;  %v131_v23 = vsub.s32 1, %v126_v20 }
  0x38   :  { %151 = vmatprep.subr.mxu0 %v106_v25  ;;  %606 = vmatprep.subr.mxu1 %v259_v34  ;;  %v96_v45 = vld [vmem:[#allocation5 + $0x28] sm:$0xff]  ;;  %v240_v48 = vld [vmem:[#allocation7 + $0x40] sm:$0xff]  ;;  %v94_v49 = vld [vmem:[#allocation5 + $0x18] sm:$0xff] }
  0x39   :  { %152 = vmatpush1.msra.mxu0 %v105_v27  ;;  %607 = vmatpush3.msra.mxu1 %v243_v36  ;;  %v255_v50 = vld [vmem:[#allocation7 + $0xb8] sm:$0xff]  ;;  %v93_v51 = vld [vmem:[#allocation5 + $0x10] sm:$0xff]  ;;  %v92_v53 = vld [vmem:[#allocation5 + $0x8] sm:$0xff] }
  0x3a   :  { %153 = vmatprep.subr.mxu0 %v104_v29  ;;  %608 = vmatprep.subr.mxu1 %v258_v38  ;;  %v239_v52 = vld [vmem:[#allocation7 + $0x38] sm:$0xff]  ;;  %v254_v54 = vld [vmem:[#allocation7 + $0xb0] sm:$0xff]  ;;  %v91_v55 = vld [vmem:[#allocation5] sm:$0xff] }
  0x3b   :  { %154 = vmatpush1.msra.mxu0 %v103_v31  ;;  %609 = vmatpush3.msra.mxu1 %v242_v40  ;;  %v238_v56 = vld [vmem:[#allocation7 + $0x30] sm:$0xff]  ;;  %v87_v57 = vld [vmem:[#allocation2] sm:$0xff]  ;;  %v253_v58 = vld [vmem:[#allocation7 + $0xa8] sm:$0xff] }
  0x3c   :  { %155 = vmatprep.subr.mxu0 %v102_v33  ;;  %610 = vmatprep.subr.mxu1 %v257_v42  ;;  %v237_v59 = vld [vmem:[#allocation7 + $0x28] sm:$0xff]  ;;  %v252_v60 = vld [vmem:[#allocation7 + $0xa0] sm:$0xff]  ;;  %v89_v63 = vld [vmem:[#allocation2 + $0x10] sm:$0xff] }
  0x3d   :  { %156 = vmatpush1.msra.mxu0 %v101_v35  ;;  %611 = vmatpush3.msra.mxu1 %v241_v44  ;;  %v236_v61 = vld [vmem:[#allocation7 + $0x20] sm:$0xff]  ;;  %v88_v62 = vld [vmem:[#allocation2 + $0x8] sm:$0xff]  ;;  %v90_v1 = vld [vmem:[#allocation2 + $0x18] sm:$0xff] }
  0x3e   :  { %157 = vmatprep.subr.mxu0 %v100_v37  ;;  %612 = vmatprep.subr.mxu1 %v256_v46  ;;  %v251_v2 = vld [vmem:[#allocation7 + $0x98] sm:$0xff]  ;;  %v250_v4 = vld [vmem:[#allocation7 + $0x90] sm:$0xff]  ;;  %v249_v6 = vld [vmem:[#allocation7 + $0x88] sm:$0xff] }
  0x3f   :  { %158 = vmatpush1.msra.mxu0 %v99_v39  ;;  %613 = vmatpush3.msra.mxu1 %v240_v48  ;;  %v235_v3 = vld [vmem:[#allocation7 + $0x18] sm:$0xff]  ;;  %v234_v5 = vld [vmem:[#allocation7 + $0x10] sm:$0xff]  ;;  %v233_v7 = vld [vmem:[#allocation7 + $0x8] sm:$0xff] }
  0x40   :  { %159 = vmatprep.subr.mxu0 %v98_v41  ;;  %614 = vmatprep.subr.mxu1 %v255_v50  ;;  %v248_v8 = vld [vmem:[#allocation7 + $0x80] sm:$0xff]  ;;  %v374_v10 = vld [vmem:[%s1034_s5 + $0x70] sm:$0xff]  ;;  %v373_v11 = vld [vmem:[%s1034_s5 + $0x68] sm:$0xff] }
  0x41   :  { %160 = vmatpush1.msra.mxu0 %v97_v43  ;;  %615 = vmatpush3.msra.mxu1 %v239_v52  ;;  %v232_v9 = vld [vmem:[#allocation7] sm:$0xff]  ;;  %v371_v13 = vld [vmem:[%s1034_s5 + $0x58] sm:$0xff]  ;;  %v370_v14 = vld [vmem:[%s1034_s5 + $0x50] sm:$0xff] }
  0x42   :  { %161 = vmatprep.subr.mxu0 %v96_v45  ;;  %616 = vmatprep.subr.mxu1 %v254_v54  ;;  %v372_v12 = vld [vmem:[%s1034_s5 + $0x60] sm:$0xff]  ;;  %v369_v15 = vld [vmem:[%s1034_s5 + $0x48] sm:$0xff]  ;;  %v367_v17 = vld [vmem:[%s1034_s5 + $0x38] sm:$0xff] }
  0x43   :  { %162 = vmatpush1.msra.mxu0 %v95_v47  ;;  %617 = vmatpush3.msra.mxu1 %v238_v56  ;;  %v368_v16 = vld [vmem:[%s1034_s5 + $0x40] sm:$0xff]  ;;  %v366_v18 = vld [vmem:[%s1034_s5 + $0x30] sm:$0xff]  ;;  %v365_v50 = vld [vmem:[%s1034_s5 + $0x28] sm:$0xff] }
  0x44   :  { %163 = vmatprep.subr.mxu0 %v94_v49  ;;  %618 = vmatprep.subr.mxu1 %v253_v58  ;;  %v123_v22 = vld [vmem:[%s1031_s2] sm:$0x3]  ;;  %v363_v52 = vld [vmem:[%s1034_s5 + $0x18] sm:$0xff]  ;;  %v361_v54 = vld [vmem:[%s1034_s5 + $0x8] sm:$0xff] }
  0x45   :  { %164 = vmatpush1.msra.mxu0 %v93_v51  ;;  %619 = vmatpush3.msra.mxu1 %v237_v59  ;;  %v128_v24 = vrot.slane %v123_v22, %v127_v21  ;;  %v132_v25 = vrot.slane %v123_v22, %v131_v23  ;;  %v364_v51 = vld [vmem:[%s1034_s5 + $0x20] sm:$0xff]  ;;  %v487_v56 = vld [vmem:[%s1036_s7 + $0x78] sm:$0xff]  ;;  %v485_v58 = vld [vmem:[%s1036_s7 + $0x68] sm:$0xff] }
  0x46   :  { %165 = vmatprep.subr.mxu0 %v92_v53  ;;  %620 = vmatprep.subr.mxu1 %v252_v60  ;;  %v362_v53 = vld [vmem:[%s1034_s5 + $0x10] sm:$0xff]  ;;  %v484_v59 = vld [vmem:[%s1036_s7 + $0x60] sm:$0xff]  ;;  %v483_v60 = vld [vmem:[%s1036_s7 + $0x58] sm:$0xff] }
  0x47   :  { %166 = vmatpush1.msra.mxu0 %v91_v55  ;;  %621 = vmatpush3.msra.mxu1 %v236_v61  ;;  %v360_v55 = vld [vmem:[%s1034_s5] sm:$0xff]  ;;  %v482_v61 = vld [vmem:[%s1036_s7 + $0x50] sm:$0xff] }
  0x48   :  { %200 = vmatmul.mubr.f32.vlgmr.msra.gmra.mxu0 %v87_v57  ;;  %622 = vmatprep.subr.mxu1 %v251_v2  ;;  %v486_v57 = vld [vmem:[%s1036_s7 + $0x70] sm:$0xff] }
  0x49   :  { %205 = vmatprep.mubr.f32.mxu0 %v837_v0  ;;  %623 = vmatpush3.msra.mxu1 %v235_v3  ;;  %v478_v2 = vld [vmem:[%s1036_s7 + $0x30] sm:$0xff]  ;;  %v477_v3 = vld [vmem:[%s1036_s7 + $0x28] sm:$0xff] }
  0x4a   :  { %624 = vmatprep.subr.mxu1 %v250_v4  ;;  %v476_v4 = vld [vmem:[%s1036_s7 + $0x20] sm:$0xff] }
  0x4b   :  { %625 = vmatpush3.msra.mxu1 %v234_v5 }
  0x4c   :  { %206 = vmatmul.mubr.f32.gmra.mxu0 %v88_v62  ;;  %626 = vmatprep.subr.mxu1 %v249_v6  ;;  %v481_v62 = vld [vmem:[%s1036_s7 + $0x48] sm:$0xff]  ;;  %v595_v6 = vld [vmem:[%s1033_s4] ss:$0 sm:$0xff] }
  0x4d   :  { %211 = vmatprep.mubr.f32.mxu0 %v837_v0  ;;  %627 = vmatpush3.msra.mxu1 %v233_v7 }
  0x4e   :  { %628 = vmatprep.subr.mxu1 %v248_v8 }
  0x4f   :  { %629 = vmatpush3.msra.mxu1 %v232_v9 }
  0x50   :  { %212 = vmatmul.mubr.f32.gmra.mxu0 %v89_v63  ;;  %720 = vmatprep.subr.mxu1 %v487_v56  ;;  %v480_v63 = vld [vmem:[%s1036_s7 + $0x40] sm:$0xff] }
  0x51   :  { %217 = vmatprep.mubr.f32.mxu0 %v837_v0  ;;  %v375_v0 = vld [vmem:[%s1034_s5 + $0x78] sm:$0xff] }
  0x52   :  { %682 = vmatprep.subr.mxu0 %v375_v0 }
  0x53   :  { %683 = vmatpush3.msra.mxu0 %v375_v0 }
  0x54   :  { %218 = vmatmul.mubr.f32.gmra.mxu0 %v90_v1  ;;  %684 = vmatprep.subr.mxu0 %v374_v10  ;;  %v479_v1 = vld [vmem:[%s1036_s7 + $0x38] sm:$0xff] }
  0x55   :  { %685 = vmatpush3.msra.mxu0 %v374_v10 }
  0x56   :  { %686 = vmatprep.subr.mxu0 %v373_v11 }
  0x57   :  { %687 = vmatpush3.msra.mxu0 %v373_v11 }
  0x58   :  { %688 = vmatprep.subr.mxu0 %v372_v12 }
  0x59   :  { %689 = vmatpush3.msra.mxu0 %v372_v12 }
  0x5a   :  { %690 = vmatprep.subr.mxu0 %v371_v13 }
  0x5b   :  { %691 = vmatpush3.msra.mxu0 %v371_v13 }
  0x5c   :  { %692 = vmatprep.subr.mxu0 %v370_v14 }
  0x5d   :  { %693 = vmatpush3.msra.mxu0 %v370_v14 }
  0x5e   :  { %694 = vmatprep.subr.mxu0 %v369_v15 }
  0x5f   :  { %695 = vmatpush3.msra.mxu0 %v369_v15 }
  0x60   :  { %696 = vmatprep.subr.mxu0 %v368_v16 }
  0x61   :  { %697 = vmatpush3.msra.mxu0 %v368_v16 }
  0x62   :  { %698 = vmatprep.subr.mxu0 %v367_v17 }
  0x63   :  { %699 = vmatpush3.msra.mxu0 %v367_v17 }
  0x64   :  { %700 = vmatprep.subr.mxu0 %v366_v18 }
  0x65   :  { %701 = vmatpush3.msra.mxu0 %v366_v18 }
  0x66   :  { %702 = vmatprep.subr.mxu0 %v365_v50 }
  0x67   :  { %703 = vmatpush3.msra.mxu0 %v365_v50 }
  0x68   :  { %704 = vmatprep.subr.mxu0 %v364_v51 }
  0x69   :  { %705 = vmatpush3.msra.mxu0 %v364_v51 }
  0x6a   :  { %706 = vmatprep.subr.mxu0 %v363_v52 }
  0x6b   :  { %707 = vmatpush3.msra.mxu0 %v363_v52 }
  0x6c   :  { %708 = vmatprep.subr.mxu0 %v362_v53 }
  0x6d   :  { %709 = vmatpush3.msra.mxu0 %v362_v53 }
  0x6e   :  { %710 = vmatprep.subr.mxu0 %v361_v54 }
  0x6f   :  { %711 = vmatpush3.msra.mxu0 %v361_v54 }
  0x70   :  { %712 = vmatprep.subr.mxu0 %v360_v55 }
  0x71   :  { %713 = vmatpush3.msra.mxu0 %v360_v55 }
 0x108   :  { %v201_v26 = vpop.f32.mrf.mxu0 }
 0x109   :  { %v202_v27 = vadd.f32 %v201_v26, %v128_v24  ;;  %v474_v26 = vld [vmem:[%s1036_s7 + $0x10] sm:$0xff] }
 0x10a   :  { %v203_v28 = vpop.f32.mrf.mxu0 }
 0x10b   :  { %v204_v29 = vadd.f32 %v203_v28, %v132_v25  ;;  %v224_v32 = vmax.f32 %v202_v27, 0.0  ;;  %v473_v27 = vld [vmem:[%s1036_s7 + $0x8] sm:$0xff]  ;;  %v472_v28 = vld [vmem:[%s1036_s7] sm:$0xff] }
 0x10c   :  { %v207_v30 = vpop.f32.mrf.mxu0 }
 0x10d   :  { %v225_v31 = vmax.f32 %v204_v29, 0.0  ;;  %v208_v33 = vadd.f32 %v207_v30, %v128_v24  ;;  %v596_v29 = vld [vmem:[%s1035_s6] ss:$0 sm:$0xff] }
 0x10e   :  { %v209_v34 = vpop.f32.mrf.mxu0 }
 0x10f   :  { %v210_v35 = vadd.f32 %v209_v34, %v132_v25  ;;  %335 = vmatprep.mubr.f32.mxu1 %v225_v31  ;;  %v226_v38 = vmax.f32 %v208_v33, 0.0 }
 0x110   :  { %v213_v36 = vpop.f32.mrf.mxu0  ;;  %336 = vmatmul.mubr.f32.vlgmr.msra.gmra.mxu1 %v224_v32 }
 0x111   :  { %v227_v37 = vmax.f32 %v210_v35, 0.0  ;;  %v214_v39 = vadd.f32 %v213_v36, %v128_v24  ;;  %721 = vmatpush3.msra.mxu1 %v487_v56 }
 0x112   :  { %v215_v40 = vpop.f32.mrf.mxu0  ;;  %722 = vmatprep.subr.mxu1 %v486_v57 }
 0x113   :  { %v216_v41 = vadd.f32 %v215_v40, %v132_v25  ;;  %340 = vmatprep.mubr.f32.mxu1 %v227_v37  ;;  %v228_v44 = vmax.f32 %v214_v39, 0.0  ;;  %723 = vmatpush3.msra.mxu1 %v486_v57 }
 0x114   :  { %v219_v42 = vpop.f32.mrf.mxu0  ;;  %341 = vmatmul.mubr.f32.gmra.mxu1 %v226_v38  ;;  %724 = vmatprep.subr.mxu1 %v485_v58 }
 0x115   :  { %v229_v43 = vmax.f32 %v216_v41, 0.0  ;;  %v220_v45 = vadd.f32 %v219_v42, %v128_v24  ;;  %725 = vmatpush3.msra.mxu1 %v485_v58  ;;  %v597_v42 = vld [vmem:[%s1037_s8] ss:$0 sm:$0xff] }
 0x116   :  { %v221_v46 = vpop.f32.mrf.mxu0  ;;  %726 = vmatprep.subr.mxu1 %v484_v59 }
 0x117   :  { %v222_v47 = vadd.f32 %v221_v46, %v132_v25  ;;  %345 = vmatprep.mubr.f32.mxu1 %v229_v43  ;;  %v230_v49 = vmax.f32 %v220_v45, 0.0  ;;  %727 = vmatpush3.msra.mxu1 %v484_v59  ;;  %v475_v25 = vld [vmem:[%s1036_s7 + $0x18] sm:$0xff] }
 0x118   :  { %346 = vmatmul.mubr.f32.gmra.mxu1 %v228_v44  ;;  %728 = vmatprep.subr.mxu1 %v483_v60 }
 0x119   :  { %v231_v48 = vmax.f32 %v222_v47, 0.0  ;;  %729 = vmatpush3.msra.mxu1 %v483_v60 }
 0x11a   :  { %730 = vmatprep.subr.mxu1 %v482_v61 }
 0x11b   :  { %350 = vmatprep.mubr.f32.mxu1 %v231_v48  ;;  %731 = vmatpush3.msra.mxu1 %v482_v61 }
 0x11c   :  { %351 = vmatmul.mubr.f32.gmra.mxu1 %v230_v49  ;;  %732 = vmatprep.subr.mxu1 %v481_v62 }
 0x11d   :  { %733 = vmatpush3.msra.mxu1 %v481_v62 }
 0x11e   :  { %734 = vmatprep.subr.mxu1 %v480_v63 }
 0x11f   :  { %735 = vmatpush3.msra.mxu1 %v480_v63 }
 0x120   :  { %736 = vmatprep.subr.mxu1 %v479_v1 }
 0x121   :  { %737 = vmatpush3.msra.mxu1 %v479_v1 }
 0x122   :  { %738 = vmatprep.subr.mxu1 %v478_v2 }
 0x123   :  { %739 = vmatpush3.msra.mxu1 %v478_v2 }
 0x124   :  { %740 = vmatprep.subr.mxu1 %v477_v3 }
 0x125   :  { %741 = vmatpush3.msra.mxu1 %v477_v3 }
 0x126   :  { %742 = vmatprep.subr.mxu1 %v476_v4 }
 0x127   :  { %743 = vmatpush3.msra.mxu1 %v476_v4 }
 0x128   :  { %744 = vmatprep.subr.mxu1 %v475_v25 }
 0x129   :  { %745 = vmatpush3.msra.mxu1 %v475_v25 }
 0x12a   :  { %746 = vmatprep.subr.mxu1 %v474_v26 }
 0x12b   :  { %747 = vmatpush3.msra.mxu1 %v474_v26 }
 0x12c   :  { %748 = vmatprep.subr.mxu1 %v473_v27 }
 0x12d   :  { %749 = vmatpush3.msra.mxu1 %v473_v27 }
 0x12e   :  { %750 = vmatprep.subr.mxu1 %v472_v28 }
 0x12f   :  { %751 = vmatpush3.msra.mxu1 %v472_v28 }
 0x1d0   :  { %v630_v5 = vpop.f32.mrf.mxu1 }
 0x1d2   :  { %v631_v7 = vpop.f32.mrf.mxu1 }
 0x1d3   :  { %v632_v8 = vadd.f32 %v631_v7, %v630_v5 }
 0x1d4   :  { %v633_v9 = vpop.f32.mrf.mxu1 }
 0x1d5   :  { %v338_v0 = vadd.f32 %v632_v8, %v595_v6 }
 0x1d6   :  { %v634_v10 = vpop.f32.mrf.mxu1 }
 0x1d7   :  { %v356_v11 = vmax.f32 %v338_v0, 0.0  ;;  %v635_v12 = vadd.f32 %v634_v10, %v633_v9 }
 0x1d8   :  { %v636_v13 = vpop.f32.mrf.mxu1 }
 0x1d9   :  { %v343_v14 = vadd.f32 %v635_v12, %v595_v6  ;;  %714 = vmatprep.mubr.f32.mxu0 %v356_v11 }
 0x1da   :  { %v637_v15 = vpop.f32.mrf.mxu1 }
 0x1db   :  { %v357_v16 = vmax.f32 %v343_v14, 0.0  ;;  %v638_v17 = vadd.f32 %v637_v15, %v636_v13 }
 0x1dc   :  { %v639_v18 = vpop.f32.mrf.mxu1 }
 0x1dd   :  { %v348_v19 = vadd.f32 %v638_v17, %v595_v6  ;;  %715 = vmatmul.mubr.f32.vlgmr.msra.gmra.mxu0 %v357_v16 }
 0x1de   :  { %v640_v20 = vpop.f32.mrf.mxu1 }
 0x1df   :  { %v358_v21 = vmax.f32 %v348_v19, 0.0  ;;  %v641_v22 = vadd.f32 %v640_v20, %v639_v18 }
 0x1e1   :  { %v353_v23 = vadd.f32 %v641_v22, %v595_v6  ;;  %717 = vmatprep.mubr.f32.mxu0 %v358_v21 }
 0x1e3   :  { %v359_v24 = vmax.f32 %v353_v23, 0.0 }
 0x1e5   :  { %718 = vmatmul.mubr.f32.gmra.mxu0 %v359_v24 }
 0x29d   :  { %v716_v30 = vpop.f32.mrf.mxu0 }
 0x29e   :  { %v455_v31 = vadd.f32 %v716_v30, %v596_v29 }
 0x29f   :  { %v449_v32 = vpop.f32.mrf.mxu0 }
 0x2a0   :  { %v450_v33 = vadd.f32 %v596_v29, %v449_v32  ;;  %v469_v35 = vmax.f32 %v455_v31, 0.0 }
 0x2a2   :  { %v468_v34 = vmax.f32 %v450_v33, 0.0 }
 0x2a4   :  { %752 = vmatprep.mubr.f32.mxu1 %v468_v34 }
 0x2a5   :  { %v719_v36 = vpop.f32.mrf.mxu0  ;;  %753 = vmatmul.mubr.f32.vlgmr.msra.gmra.mxu1 %v469_v35 }
 0x2a6   :  { %v465_v37 = vadd.f32 %v719_v36, %v596_v29 }
 0x2a7   :  { %v459_v38 = vpop.f32.mrf.mxu0 }
 0x2a8   :  { %v460_v39 = vadd.f32 %v596_v29, %v459_v38  ;;  %v471_v41 = vmax.f32 %v465_v37, 0.0 }
 0x2aa   :  { %v470_v40 = vmax.f32 %v460_v39, 0.0 }
 0x2ac   :  { %755 = vmatprep.mubr.f32.mxu1 %v470_v40 }
 0x2ad   :  { %756 = vmatmul.mubr.f32.gmra.mxu1 %v471_v41 }
 0x365   :  { %v754_v43 = vpop.f32.mrf.mxu1 }
 0x366   :  { %v567_v44 = vadd.f32 %v754_v43, %v597_v42 }
 0x367   :  { %v561_v45 = vpop.f32.mrf.mxu1 }
 0x368   :  { %v581_v46 = vmax.f32 %v567_v44, 0.0  ;;  %v562_v47 = vadd.f32 %v597_v42, %v561_v45 }
 0x36a   :  { %586 = vst.msk [vmem:[%s1038_s9 + $0x8] sm:$0xff] %vm584_vm2, %v581_v46  ;;  %v580_v48 = vmax.f32 %v562_v47, 0.0 }
 0x36c   :  { %585 = vst.msk [vmem:[%s1038_s9] sm:$0xff] %vm584_vm2, %v580_v48 }
 0x36d   :  { %v757_v49 = vpop.f32.mrf.mxu1 }
 0x36e   :  { %v577_v50 = vadd.f32 %v757_v49, %v597_v42 }
 0x36f   :  { %v571_v51 = vpop.f32.mrf.mxu1 }
 0x370   :  { %v583_v52 = vmax.f32 %v577_v50, 0.0  ;;  %v572_v53 = vadd.f32 %v597_v42, %v571_v51 }
 0x372   :  { %588 = vst.msk [vmem:[%s1038_s9 + $0x18] sm:$0xff] %vm584_vm2, %v583_v52  ;;  %v582_v54 = vmax.f32 %v572_v53, 0.0 }
 0x374   :  { %587 = vst.msk [vmem:[%s1038_s9 + $0x10] sm:$0xff] %vm584_vm2, %v582_v54 }
 0x375   :  { %593 = vsyncpa [#allocation4], 1 }
 0x376   :  { %594 = vsyncpa [#allocation6], 1 }

</bundles_post_ra>
